<compile_context>
chip_gen: v6e
topology: v6e:2x2x1
jax: 0.10.0
libtpu: 0.0.40
codegen_flags: <defaults>
</compile_context>

<pallas_src>
import math
import jax
import jax.numpy as jnp
from jax.experimental import pallas as pl
from jax.experimental.pallas import tpu as pltpu


def lora_kernel(idx_ref, s_ref, x_ref, d_ref, u_ref, o_ref):
    # idx_ref: (2,) int32 in SMEM (scalar prefetch; consumed by index_maps)
    # s_ref  : (1,)  f32  in SMEM (scale S)
    # x_ref  : (TM, D)   d_ref: (D, L)   u_ref: (L, D)   o_ref: (TM, D)
    del idx_ref  # only used by the BlockSpec index_maps
    cdt = x_ref.dtype
    h = jnp.dot(x_ref[...], d_ref[...].astype(cdt),
                preferred_element_type=jnp.float32)
    y = jnp.dot(h.astype(cdt), u_ref[...].astype(cdt),
                preferred_element_type=jnp.float32)
    o_ref[...] = (y * s_ref[0]).astype(o_ref.dtype)


def lora_forward(x, d_all, u_all, s_all, l, f, *, tm=512, compute_dtype=None):
    """x: (B, N, D). d_all: (12, 2, D, L), u_all: (12, 2, L, D), s_all: (12, 2).

    Returns (B, N, D) with the same dtype as x.
    compute_dtype: optional dtype (e.g. jnp.bfloat16) for the HBM->VMEM /
    MXU-input path; accumulation and the S scale stay in f32.
    """
    B, N, D = x.shape
    L = d_all.shape[-1]
    cdt = jnp.dtype(compute_dtype) if compute_dtype is not None else x.dtype
    out_dtype = x.dtype

    M = B * N
    x2 = x.reshape(M, D).astype(cdt)

    # Row tile: multiple of 8, no bigger than needed.
    tm = int(tm)
    tm = min(tm, ((M + 7) // 8) * 8)
    tm = max(8, (tm // 8) * 8)
    m_pad = pl.cdiv(M, tm) * tm
    if m_pad != M:
        x2 = jnp.pad(x2, ((0, m_pad - M), (0, 0)))
    grid_m = m_pad // tm

    # Scalar prefetch: (layer, branch) indices used by the weight index_maps.
    idx = jnp.asarray([l, f], dtype=jnp.int32)
    # Scale S (scalar gather in the wrapper is negligible).
    S = s_all[l, f].reshape((1,)).astype(jnp.float32)

    in_bytes = jnp.dtype(cdt).itemsize
    out_bytes = jnp.dtype(out_dtype).itemsize
    w_bytes = jnp.dtype(d_all.dtype).itemsize

    flops = 4 * m_pad * D * L  # two matmuls, 2*M*D*L each
    bytes_accessed = (in_bytes * m_pad * D            # x in
                      + out_bytes * m_pad * D         # out
                      + w_bytes * 2 * D * L)          # selected D_, U_

    # VMEM budget: double-buffered x/out tiles + (double-buffered) weights.
    vmem_need = (2 * tm * D * (in_bytes + out_bytes)
                 + 2 * 2 * D * L * w_bytes)
    vmem_limit = int(min(max(2 * vmem_need + (8 << 20), 32 << 20), 64 << 20))

    out2 = pl.pallas_call(
        lora_kernel,
        out_shape=jax.ShapeDtypeStruct((m_pad, D), out_dtype),
        grid_spec=pltpu.PrefetchScalarGridSpec(
            num_scalar_prefetch=1,
            grid=(grid_m,),
            in_specs=[
                pl.BlockSpec(memory_space=pltpu.MemorySpace.SMEM),    # S
                pl.BlockSpec((tm, D), lambda i, idx: (i, 0)),         # x tile
                pl.BlockSpec((None, None, D, L),
                             lambda i, idx: (idx[0], idx[1], 0, 0)),  # D_
                pl.BlockSpec((None, None, L, D),
                             lambda i, idx: (idx[0], idx[1], 0, 0)),  # U_
            ],
            out_specs=pl.BlockSpec((tm, D), lambda i, idx: (i, 0)),
        ),
        compiler_params=pltpu.CompilerParams(
            dimension_semantics=("parallel",),
            vmem_limit_bytes=vmem_limit),
        cost_estimate=pl.CostEstimate(
            flops=flops, transcendentals=0, bytes_accessed=bytes_accessed),
    )(idx, S, x2, d_all, u_all)

    return out2[:M].reshape(B, N, D)


def init_lora_params(key, embed_dim, low_dim, init_value=32.0, n_layers=12):
    """Deterministic parameter init matching the module shapes.
    d: he_uniform on slice 0, copied to slice 1 (as tensor_prompt does).
    u: same init path as the module actually uses (it passes d_init).
    s: init_value / (embed_dim / low_dim), per branch."""
    kd, ku = jax.random.split(key)
    # kaiming_uniform bound with a=1: sqrt(6 / ((1 + a^2) * fan_in)),
    # fan_in = size(1) of the 2-D slice.
    bound_d = math.sqrt(6.0 / (2.0 * low_dim))     # d slice: (embed, low)
    bound_u = math.sqrt(6.0 / (2.0 * embed_dim))   # u slice: (low, embed)

    d0 = jax.random.uniform(kd, (n_layers, 1, embed_dim, low_dim),
                            minval=-bound_d, maxval=bound_d, dtype=jnp.float32)
    d_all = jnp.broadcast_to(d0, (n_layers, 2, embed_dim, low_dim))

    u0 = jax.random.uniform(ku, (n_layers, 1, low_dim, embed_dim),
                            minval=-bound_u, maxval=bound_u, dtype=jnp.float32)
    u_all = jnp.broadcast_to(u0, (n_layers, 2, low_dim, embed_dim))

    r = embed_dim / low_dim
    s_all = jnp.full((n_layers, 2), init_value / r, dtype=jnp.float32)
    return d_all, u_all, s_all


if __name__ == "__main__":
    # Small shapes consistent with the forward: x is (B, N, embed_dim).
    # embed_dim=128 keeps the output last dim lane-dense (v5e store slot);
    # N=100 gives M=200 so the M-tiling + tail padding paths are exercised.
    B, N, embed_dim, low_dim = 2, 100, 128, 32
    key = jax.random.PRNGKey(0)
    kx, kp = jax.random.split(key)

    x = jax.random.normal(kx, (B, N, embed_dim), dtype=jnp.float32)
    d_all, u_all, s_all = init_lora_params(kp, embed_dim, low_dim)

    l, f = 3, 0  # layer index in lora_layers, branch f in {0, 1}

    # Plain-JAX reference (full precision).
    hi = jax.lax.Precision.HIGHEST
    ref = jnp.einsum('bnd,ds->bns', x, d_all[l, f], precision=hi)
    ref = jnp.einsum('bns,sd->bnd', ref, u_all[l, f], precision=hi) * s_all[l, f]

    # f32 path (tm=64 -> grid of 4 tiles, M padded 200 -> 256).
    out = lora_forward(x, d_all, u_all, s_all, l, f, tm=64)
    out = jax.block_until_ready(out)
    assert out.shape == (B, N, embed_dim)
    assert jnp.allclose(out, ref, atol=1e-4, rtol=1e-4)

    # bf16 compute path (halved HBM bytes for x); loose normalized check.
    out_bf = lora_forward(x, d_all, u_all, s_all, l, f, tm=64,
                          compute_dtype=jnp.bfloat16)
    out_bf = jax.block_until_ready(out_bf)
    assert out_bf.shape == (B, N, embed_dim)
    assert bool(jnp.all(jnp.isfinite(out_bf)))
    rel = jnp.max(jnp.abs(out_bf - ref)) / (jnp.max(jnp.abs(ref)) + 1e-6)
    assert float(rel) < 0.1

    print("KERNEL_OK")
</pallas_src>

<mosaic_0001>
module attributes {stable_mosaic.version = 11 : i64} {
  func.func @lora_kernel(%arg0: i32, %arg1: memref<2xi32, #tpu.memory_space<smem>>, %arg2: memref<1xf32, #tpu.memory_space<smem>>, %arg3: memref<64x128xf32, #tpu.memory_space<vmem>>, %arg4: memref<1x1x128x32xf32, #tpu.memory_space<vmem>>, %arg5: memref<1x1x32x128xf32, #tpu.memory_space<vmem>>, %arg6: memref<64x128xf32, #tpu.memory_space<vmem>>) attributes {dimension_semantics = [#tpu.dimension_semantics<parallel>], iteration_bounds = array<i64: 4>, scalar_prefetch = 1 : i64, scratch_operands = 0 : i64, tpu.core_type = #tpu.core_type<tc>, window_params = [{transform_indices = @transform_0, window_bounds = array<i64: 1>}, {transform_indices = @transform_1, window_bounds = array<i64: 64, 128>}, {transform_indices = @transform_2, window_bounds = array<i64: 1, 1, 128, 32>}, {transform_indices = @transform_3, window_bounds = array<i64: 1, 1, 32, 128>}, {transform_indices = @transform_4, window_bounds = array<i64: 64, 128>}]} {
    %c0 = arith.constant 0 : index
    %c0_0 = arith.constant 0 : index
    %0 = vector.load %arg3[%c0, %c0_0] : memref<64x128xf32, #tpu.memory_space<vmem>>, vector<64x128xf32>
    %c0_1 = arith.constant 0 : index
    %c0_2 = arith.constant 0 : index
    %c0_3 = arith.constant 0 : index
    %c0_4 = arith.constant 0 : index
    %1 = vector.load %arg4[%c0_1, %c0_2, %c0_3, %c0_4] : memref<1x1x128x32xf32, #tpu.memory_space<vmem>>, vector<1x1x128x32xf32>
    %2 = vector.shape_cast %1 : vector<1x1x128x32xf32> to vector<128x32xf32>
    %cst = arith.constant dense<0.000000e+00> : vector<64x32xf32>
    %3 = tpu.matmul %0, %2, %cst {dimension_numbers = #tpu.dot_dimension_numbers<[1], [0], [0], [1], [0, 0, 1, 1], [], []>} : vector<64x128xf32>, vector<128x32xf32>, vector<64x32xf32> -> vector<64x32xf32>
    %c0_5 = arith.constant 0 : index
    %c0_6 = arith.constant 0 : index
    %c0_7 = arith.constant 0 : index
    %c0_8 = arith.constant 0 : index
    %4 = vector.load %arg5[%c0_5, %c0_6, %c0_7, %c0_8] : memref<1x1x32x128xf32, #tpu.memory_space<vmem>>, vector<1x1x32x128xf32>
    %5 = vector.shape_cast %4 : vector<1x1x32x128xf32> to vector<32x128xf32>
    %cst_9 = arith.constant dense<0.000000e+00> : vector<64x128xf32>
    %6 = tpu.matmul %3, %5, %cst_9 {dimension_numbers = #tpu.dot_dimension_numbers<[1], [0], [0], [1], [0, 0, 1, 1], [], []>} : vector<64x32xf32>, vector<32x128xf32>, vector<64x128xf32> -> vector<64x128xf32>
    %c0_10 = arith.constant 0 : index
    %7 = memref.load %arg2[%c0_10] : memref<1xf32, #tpu.memory_space<smem>>
    %8 = vector.broadcast %7 : f32 to vector<64x128xf32>
    %9 = arith.mulf %6, %8 : vector<64x128xf32>
    %c0_11 = arith.constant 0 : index
    %c0_12 = arith.constant 0 : index
    %10 = vector.load %arg6[%c0_11, %c0_12] : memref<64x128xf32, #tpu.memory_space<vmem>>, vector<64x128xf32>
    tpu.vector_store %arg6[%c0_11, %c0_12], %9 {strides = array<i32>} : memref<64x128xf32, #tpu.memory_space<vmem>>, vector<64x128xf32>,
    return
  }
  func.func @transform_0(%arg0: i32, %arg1: memref<2xi32, #tpu.memory_space<smem>>) -> i32 {
    %c0_i32 = arith.constant 0 : i32
    %c0_i32_0 = arith.constant 0 : i32
    return %c0_i32 : i32
  }
  func.func @transform_1(%arg0: i32, %arg1: memref<2xi32, #tpu.memory_space<smem>>) -> (i32, i32) {
    %c0_i32 = arith.constant 0 : i32
    %c0_i32_0 = arith.constant 0 : i32
    return %arg0, %c0_i32 : i32, i32
  }
  func.func @transform_2(%arg0: i32, %arg1: memref<2xi32, #tpu.memory_space<smem>>) -> (i32, i32, i32, i32) {
    %c0 = arith.constant 0 : index
    %0 = memref.load %arg1[%c0] : memref<2xi32, #tpu.memory_space<smem>>
    %c1 = arith.constant 1 : index
    %1 = memref.load %arg1[%c1] : memref<2xi32, #tpu.memory_space<smem>>
    %c0_i32 = arith.constant 0 : i32
    %c0_i32_0 = arith.constant 0 : i32
    %c0_i32_1 = arith.constant 0 : i32
    return %0, %1, %c0_i32, %c0_i32_0 : i32, i32, i32, i32
  }
  func.func @transform_3(%arg0: i32, %arg1: memref<2xi32, #tpu.memory_space<smem>>) -> (i32, i32, i32, i32) {
    %c0 = arith.constant 0 : index
    %0 = memref.load %arg1[%c0] : memref<2xi32, #tpu.memory_space<smem>>
    %c1 = arith.constant 1 : index
    %1 = memref.load %arg1[%c1] : memref<2xi32, #tpu.memory_space<smem>>
    %c0_i32 = arith.constant 0 : i32
    %c0_i32_0 = arith.constant 0 : i32
    %c0_i32_1 = arith.constant 0 : i32
    return %0, %1, %c0_i32, %c0_i32_0 : i32, i32, i32, i32
  }
  func.func @transform_4(%arg0: i32, %arg1: memref<2xi32, #tpu.memory_space<smem>>) -> (i32, i32) {
    %c0_i32 = arith.constant 0 : i32
    %c0_i32_0 = arith.constant 0 : i32
    return %arg0, %c0_i32 : i32, i32
  }
}

</mosaic_0001>

<bundles_post_ra>
// kernel: tpu_custom_call.1
= control target key start
LH: loop header
LB: loop body
LE: loop exit
PB: predicated region body
PF: predicated region fallthrough
CT: control target
= control target key end

     0   :  { %s1144_s0 = inlined_call_operand.vmem [shape: s32[2], index: 0, kind: input, shape index: {}]   ;;  %s1145_s1 = inlined_call_operand.<no memory space> [shape: f32[1], index: 1, kind: input, shape index: {}]   ;;  %s1146_s2 = inlined_call_operand.vmem [shape: f32[256,128], index: 2, kind: input, shape index: {}]   ;;  %s1147_s3 = inlined_call_operand.vmem [shape: f32[12,2,128,32], index: 3, kind: input, shape index: {}]   ;;  %s1148_s4 = inlined_call_operand.vmem [shape: f32[12,2,32,128], index: 4, kind: input, shape index: {}]   ;;  %s1149_s5 = inlined_call_operand.hbm [shape: f32[256,128], index: 5, kind: output, shape index: {}]  }
   0x1   :  { %s10_s20 = sshll.u32 %s1144_s0, 4  ;;  %14 = sst [smem:[#allocation4]] %s1145_s1  ;;  %s11_s20 = int_to_ptr.vmem [resolvable:$true] %s10_s20 }
   0x2   :  { %s883_s23 = scalar_lea.vmem %s11_s20, 16  ;;  %p888_p1 = scmp.lt.s32.totalorder %s11_s20, %s11_s20 }
   0x3   :  { %p884_p0 = scmp.ne.s32.totalorder %s11_s20, %s883_s23  ;;  %p889_p2 = scmp.lt.s32.totalorder %s883_s23, %s883_s23 }
   0x5   :  { %p890_p3 = por %p889_p2, %p888_p1 }
   0x7   :  { %p891_p4 = pnand %p890_p3, %p884_p0 }
   0x9   :  { %894 = shalt.err (!%p891_p4)  }
   0xa   :  { %s959_s24 = smov [#allocation3]  }
   0xb   :  { %13 = dma.vmem_to_smem %s11_s20, 16, %s959_s24, [#allocation2] }
   0xc   :  { %937 = dma.done.wait [#allocation2], 16 }
   0xd   :  { %938 = vsyncadd [#allocation2], 4294967280 }
   0xe   :  { %16 = sfence }
   0xf   :  { %17 = vsyncpa [#allocation6], 0 }
  0x10   :  { %19 = vsyncpa [#allocation6 + $0x1], 0  ;;  %s999_s0 = smov 0   ;;  %s1001_s25 = smov 0  }
  0x11   :  { %s1003_s1 = smov 0   ;;  %s1005_s26 = smov 0  }
  0x12 LB: > { %s1020_s27 = sadd.s32 4294967295, %s957_s26   ;;  %s708_s28 = sadd.s32 4294967294, %s957_s26   ;;  %s957_s26 = sphi %s1005_s26, %s1155_s26   ;;  %s953_s1 = sphi %s1003_s1, %s1154_s1   ;;  %s949_s25 = sphi %s1001_s25, %s1153_s25   ;;  %s945_s0 = sphi %s999_s0, %s1152_s0  }
  0x13   : > { %s1024_s29 = sadd.s32 1, %s957_s26   ;;  %s143_s30 = sadd.s32 1, %s953_s1 }
  0x14   : > { %s140_s6 = ssub.s32 %s957_s26, %s1024_s29  ;;  %p153_p5 = scmp.ne.s32.totalorder %s953_s1, %s949_s25 }
  0x15   : > { %p141_p6 = scmp.eq.s32.totalorder %s140_s6, 0  ;;  %p154_p7 = scmp.eq.s32.totalorder %s1020_s27, 3 }
  0x16   : > { %p159_p8 = scmp.ne.s32.totalorder %s949_s25, %s945_s0  ;;  %p160_p9 = scmp.eq.s32.totalorder %s708_s28, 3 }
  0x17   : > { %s1035_s7 = scalar_select %p141_p6, %s953_s1, %s143_s30  }
  0x18   : > { %p1037_p10 = por %p154_p7, %p153_p5  ;;  %p1041_p11 = por %p160_p9, %p159_p8 }
  0x19   : > { %p715_p12 = scmp.ge.s32.totalorder %s957_s26, 1  ;;  %p222_p13 = scmp.lt.s32.totalorder %s957_s26, 5 }
  0x1b   : > { %p223_p0 = pnand %p715_p12, %p222_p13 }
  0x1c   : > { %s276_s10 = sld [smem:[#allocation3]] (!%p223_p0)  ;;  %s717_s11 = sshll.u32 (!%p223_p0), %s1020_s27, 3 }
  0x1d   : > { %226 = sbr.rel (%p223_p0) target bundleno = 494 (0x1ee), region = 36  ;;  %s719_s12 = sld [smem:[#allocation3 + $0x1]] (!%p223_p0) }
  0x1e   : > { %p271_p1 = scmp.lt.s32.totalorder (!%p223_p0), %s717_s11, 31  ;;  %s267_s14 = sand.u32 (!%p223_p0), 1, %s949_s25  }
  0x1f   : > { %s716_s15 = sshll.u32 (!%p223_p0), %s267_s14, 6 }
  0x22   : > { %s1157_s11 = smov (!%p271_p1, %s717_s11), 31  ;;  %p278_p2 = scmp.lt.s32.totalorder %s276_s10, 11  ;;  %vm436_vm0 = vcmask 261120  }
  0x23   : > { %s718_s13 = sshll.u32 %s1157_s11, 3  ;;  %p280_p3 = scmp.lt.s32.totalorder %s719_s12, 1 }
  0x24   : > { %s1051_s16 = scalar_lea.vmem %s1146_s2, %s718_s13  ;;  %s1159_s10 = smov (!%p278_p2, %s276_s10), 11 }
  0x25   : > { %v303_v0 = vld [vmem:[%s1051_s16] sm:$0xff]  ;;  %s1161_s12 = smov (!%p280_p3, %s719_s12), 1  ;;  %s721_s17 = sshll.u32 %s1159_s10, 5  ;;  %v304_v19 = vld [vmem:[%s1051_s16 + $0x8] sm:$0xff]  ;;  %v305_v20 = vld [vmem:[%s1051_s16 + $0x10] sm:$0xff] }
  0x26   : > { %809 = vmatprep.mubr.f32.mxu0 %v303_v0  ;;  %s725_s18 = sshll.u32 %s1159_s10, 3  ;;  %s720_s19 = sshll.u32 %s1161_s12, 4  ;;  %v306_v21 = vld [vmem:[%s1051_s16 + $0x18] sm:$0xff]  ;;  %v307_v22 = vld [vmem:[%s1051_s16 + $0x20] sm:$0xff]  ;;  %v308_v23 = vld [vmem:[%s1051_s16 + $0x28] sm:$0xff] }
  0x27   : > { %s724_s20 = sshll.u32 %s1161_s12, 2  ;;  %s284_s21 = sadd.s32 %s721_s17, %s720_s19  ;;  %v309_v24 = vld [vmem:[%s1051_s16 + $0x30] sm:$0xff]  ;;  %v310_v25 = vld [vmem:[%s1051_s16 + $0x38] sm:$0xff] }
  0x28   : > { %s297_s22 = sadd.s32 %s725_s18, %s724_s20  ;;  %s722_s23 = sshll.u32 %s284_s21, 3 }
  0x29   : > { %s1057_s30 = scalar_lea.vmem %s1147_s3, %s722_s23  ;;  %s726_s6 = sshll.u32 %s297_s22, 3 }
  0x2a   : > { %v326_v1 = vld [vmem:[%s1057_s30 + $0x78] sm:$0xff]  ;;  %v325_v2 = vld [vmem:[%s1057_s30 + $0x70] sm:$0xff]  ;;  %v324_v3 = vld [vmem:[%s1057_s30 + $0x68] sm:$0xff]  ;;  %s1065_s12 = scalar_lea.vmem %s1148_s4, %s726_s6  ;;  %s566_s13 = sld [smem:[#allocation4]] }
  0x2b   : > { %777 = vmatprep.subr.mxu0 %v326_v1  ;;  %v323_v4 = vld [vmem:[%s1057_s30 + $0x60] sm:$0xff]  ;;  %v435_v5 = vld [vmem:[%s1065_s12 + $0x18] sm:$0xff]  ;;  %v434_v6 = vld [vmem:[%s1065_s12 + $0x10] sm:$0xff]  ;;  %s269_s16 = scalar_lea.vmem [#allocation5], %s716_s15  ;;  %s740_s17 = sshll.u32 %s1020_s27, 10 }
  0x2c   : > { %778 = vmatpush3.msra.mxu0 %v326_v1  ;;  %v322_v7 = vld [vmem:[%s1057_s30 + $0x58] sm:$0xff]  ;;  %821 = vmatprep.subr.mxu1 %v435_v5  ;;  %v321_v8 = vld [vmem:[%s1057_s30 + $0x50] sm:$0xff]  ;;  %v320_v9 = vld [vmem:[%s1057_s30 + $0x48] sm:$0xff]  ;;  %s598_s18 = sshll.u32 %s269_s16, 4  ;;  %s1098_s21 = scalar_lea.hbm %s1149_s5, %s740_s17  ;;  %s1100_s18 = int_to_ptr.vmem [resolvable:$true] %s598_s18 }
  0x2d   : > { %779 = vmatprep.subr.mxu0 %v325_v2  ;;  %822 = vmatpush3.msra.mxu1 %v435_v5  ;;  %v319_v10 = vld [vmem:[%s1057_s30 + $0x40] sm:$0xff]  ;;  %v318_v11 = vld [vmem:[%s1057_s30 + $0x38] sm:$0xff]  ;;  %v317_v12 = vld [vmem:[%s1057_s30 + $0x30] sm:$0xff]  ;;  %s1104_s27 = scalar_lea.sflag [#allocation6], %s267_s14  ;;  %s895_s22 = scalar_lea.vmem %s1100_s18, 1024 }
  0x2e   : > { %780 = vmatpush3.msra.mxu0 %v325_v2  ;;  %823 = vmatprep.subr.mxu1 %v434_v6  ;;  %v316_v13 = vld [vmem:[%s1057_s30 + $0x28] sm:$0xff]  ;;  %v315_v14 = vld [vmem:[%s1057_s30 + $0x20] sm:$0xff]  ;;  %v314_v15 = vld [vmem:[%s1057_s30 + $0x18] sm:$0xff]  ;;  %p896_p4 = scmp.ne.s32.totalorder %s1100_s18, %s895_s22  ;;  %s960_s23 = smov [#allocation5]  }
  0x2f   : > { %781 = vmatprep.subr.mxu0 %v324_v3  ;;  %824 = vmatpush3.msra.mxu1 %v434_v6  ;;  %v313_v16 = vld [vmem:[%s1057_s30 + $0x10] sm:$0xff]  ;;  %v312_v17 = vld [vmem:[%s1057_s30 + $0x8] sm:$0xff]  ;;  %v311_v18 = vld [vmem:[%s1057_s30] sm:$0xff]  ;;  %s899_s24 = sshll.u32 %s960_s23, 4  ;;  %s900_s24 = int_to_ptr.vmem [resolvable:$false] %s899_s24 }
  0x30   : > { %782 = vmatpush3.msra.mxu0 %v324_v3  ;;  %v433_v26 = vld [vmem:[%s1065_s12 + $0x8] sm:$0xff]  ;;  %v432_v27 = vld [vmem:[%s1065_s12] sm:$0xff]  ;;  %v567_v36 = vstv %s566_s13  ;;  %p897_p5 = pnand %p896_p4, %p1037_p10  ;;  %s901_s28 = scalar_lea.vmem %s900_s24, 2048 }
  0x31   : > { %783 = vmatprep.subr.mxu0 %v323_v4  ;;  %825 = vmatprep.subr.mxu1 %v433_v26  ;;  %p902_p7 = scmp.lt.s32.totalorder %s1100_s18, %s900_s24  ;;  %p903_p8 = scmp.lt.s32.totalorder %s901_s28, %s895_s22 }
  0x32   : > { %784 = vmatpush3.msra.mxu0 %v323_v4  ;;  %826 = vmatpush3.msra.mxu1 %v433_v26  ;;  %p898_p6 = pneg %p897_p5 }
  0x33   : > { %785 = vmatprep.subr.mxu0 %v322_v7  ;;  %827 = vmatprep.subr.mxu1 %v432_v27  ;;  %p904_p9 = por %p903_p8, %p902_p7 }
  0x34   : > { %786 = vmatpush3.msra.mxu0 %v322_v7  ;;  %828 = vmatpush3.msra.mxu1 %v432_v27 }
  0x35   : > { %787 = vmatprep.subr.mxu0 %v321_v8  ;;  %p905_p12 = pnand %p904_p9, %p898_p6 }
  0x36   : > { %788 = vmatpush3.msra.mxu0 %v321_v8 }
  0x37   : > { %789 = vmatprep.subr.mxu0 %v320_v9 }
  0x38   : > { %790 = vmatpush3.msra.mxu0 %v320_v9 }
  0x39   : > { %791 = vmatprep.subr.mxu0 %v319_v10 }
  0x3a   : > { %792 = vmatpush3.msra.mxu0 %v319_v10 }
  0x3b   : > { %793 = vmatprep.subr.mxu0 %v318_v11 }
  0x3c   : > { %794 = vmatpush3.msra.mxu0 %v318_v11 }
  0x3d   : > { %795 = vmatprep.subr.mxu0 %v317_v12 }
  0x3e   : > { %796 = vmatpush3.msra.mxu0 %v317_v12 }
  0x3f   : > { %797 = vmatprep.subr.mxu0 %v316_v13 }
  0x40   : > { %798 = vmatpush3.msra.mxu0 %v316_v13 }
  0x41   : > { %799 = vmatprep.subr.mxu0 %v315_v14 }
  0x42   : > { %800 = vmatpush3.msra.mxu0 %v315_v14 }
  0x43   : > { %801 = vmatprep.subr.mxu0 %v314_v15 }
  0x44   : > { %802 = vmatpush3.msra.mxu0 %v314_v15 }
  0x45   : > { %803 = vmatprep.subr.mxu0 %v313_v16 }
  0x46   : > { %804 = vmatpush3.msra.mxu0 %v313_v16 }
  0x47   : > { %805 = vmatprep.subr.mxu0 %v312_v17 }
  0x48   : > { %806 = vmatpush3.msra.mxu0 %v312_v17 }
  0x49   : > { %807 = vmatprep.subr.mxu0 %v311_v18 }
  0x4a   : > { %808 = vmatpush3.msra.mxu0 %v311_v18 }
  0x4b   : > { %810 = vmatmul.mubr.f32.vlgmr.msra.gmra.mxu0 %v304_v19 }
  0x4c   : > { %812 = vmatprep.mubr.f32.mxu0 %v305_v20 }
  0x4f   : > { %813 = vmatmul.mubr.f32.gmra.mxu0 %v306_v21 }
  0x50   : > { %815 = vmatprep.mubr.f32.mxu0 %v307_v22 }
  0x53   : > { %816 = vmatmul.mubr.f32.gmra.mxu0 %v308_v23 }
  0x54   : > { %818 = vmatprep.mubr.f32.mxu0 %v309_v24 }
  0x57   : > { %819 = vmatmul.mubr.f32.gmra.mxu0 %v310_v25 }
 0x10b   : > { %v811_v28 = vpop.f32.mrf.mxu0 }
 0x10d   : > { %v393_v29 = vpop.f32.mrf.mxu0 }
 0x10e   : > { %829 = vmatprep.mubr.msk.f32.mxu1 %vm436_vm0, %v393_v29 }
 0x10f   : > { %v814_v30 = vpop.f32.mrf.mxu0  ;;  %830 = vmatmul.mubr.msk.f32.vlgmr.msra.gmra.mxu1 %vm436_vm0, %v811_v28 }
 0x111   : > { %v403_v31 = vpop.f32.mrf.mxu0 }
 0x112   : > { %832 = vmatprep.mubr.msk.f32.mxu1 %vm436_vm0, %v403_v31 }
 0x113   : > { %v817_v32 = vpop.f32.mrf.mxu0  ;;  %833 = vmatmul.mubr.msk.f32.gmra.mxu1 %vm436_vm0, %v814_v30 }
 0x115   : > { %v413_v33 = vpop.f32.mrf.mxu0 }
 0x116   : > { %835 = vmatprep.mubr.msk.f32.mxu1 %vm436_vm0, %v413_v33 }
 0x117   : > { %v820_v34 = vpop.f32.mrf.mxu0  ;;  %836 = vmatmul.mubr.msk.f32.gmra.mxu1 %vm436_vm0, %v817_v32 }
 0x119   : > { %v423_v35 = vpop.f32.mrf.mxu0 }
 0x11a   : > { %838 = vmatprep.mubr.msk.f32.mxu1 %vm436_vm0, %v423_v35 }
 0x11b   : > { %839 = vmatmul.mubr.msk.f32.gmra.mxu1 %vm436_vm0, %v820_v34 }
 0x1cf   : > { %v831_v37 = vpop.f32.mrf.mxu1 }
 0x1d0   : > { %v569_v38 = vmul.f32 %v831_v37, %v567_v36 }
 0x1d1   : > { %v527_v39 = vpop.f32.mrf.mxu1 }
 0x1d2   : > { %577 = vst [vmem:[%s269_s16 + $0x8] sm:$0xff] %v569_v38  ;;  %v568_v40 = vmul.f32 %v567_v36, %v527_v39 }
 0x1d3   : > { %v834_v41 = vpop.f32.mrf.mxu1 }
 0x1d4   : > { %576 = vst [vmem:[%s269_s16] sm:$0xff] %v568_v40  ;;  %v571_v42 = vmul.f32 %v834_v41, %v567_v36 }
 0x1d5   : > { %v537_v43 = vpop.f32.mrf.mxu1 }
 0x1d6   : > { %579 = vst [vmem:[%s269_s16 + $0x18] sm:$0xff] %v571_v42  ;;  %v570_v44 = vmul.f32 %v567_v36, %v537_v43 }
 0x1d7   : > { %v837_v45 = vpop.f32.mrf.mxu1 }
 0x1d8   : > { %578 = vst [vmem:[%s269_s16 + $0x10] sm:$0xff] %v570_v44  ;;  %v573_v46 = vmul.f32 %v837_v45, %v567_v36 }
 0x1d9   : > { %v547_v47 = vpop.f32.mrf.mxu1 }
 0x1da   : > { %581 = vst [vmem:[%s269_s16 + $0x28] sm:$0xff] %v573_v46  ;;  %v572_v48 = vmul.f32 %v567_v36, %v547_v47 }
 0x1db   : > { %v840_v49 = vpop.f32.mrf.mxu1 }
 0x1dc   : > { %580 = vst [vmem:[%s269_s16 + $0x20] sm:$0xff] %v572_v48  ;;  %v575_v50 = vmul.f32 %v840_v49, %v567_v36 }
 0x1dd   : > { %v557_v51 = vpop.f32.mrf.mxu1 }
 0x1de   : > { %583 = vst [vmem:[%s269_s16 + $0x38] sm:$0xff] %v575_v50  ;;  %v574_v52 = vmul.f32 %v567_v36, %v557_v51 }
 0x1e0   : > { %582 = vst [vmem:[%s269_s16 + $0x30] sm:$0xff] %v574_v52 }
 0x1e1   : > { %908 = shalt.err (!%p905_p12)
}
 0x1e2   : > { %s909_s30 = scalar_lea.hbm %s1098_s21, 1024  ;;  %s913_s11 = scalar_lea.hbm %s1149_s5, 4096 }
 0x1e3   : > { %p910_p13 = scmp.ne.s32.totalorder %s1098_s21, %s909_s30  ;;  %p914_p2 = scmp.lt.s32.totalorder %s1098_s21, %s1149_s5 }
 0x1e4   : > { %p915_p3 = scmp.lt.s32.totalorder %s913_s11, %s909_s30 }
 0x1e5   : > { %p911_p0 = pnand %p910_p13, %p1037_p10 }
 0x1e6   : > { %p916_p4 = por %p915_p3, %p914_p2 }
 0x1e7   : > { %p912_p1 = pneg %p911_p0 }
 0x1e9   : > { %p917_p5 = pnand %p916_p4, %p912_p1 }
 0x1eb   : > { %920 = shalt.err (!%p917_p5)
}
 0x1ec   : > { %s961_s14 = smov 128   ;;  %s962_s15 = smov 8  }
 0x1ed   : > { %841 = dma.vmem_to_hbm [thread:$0]  (%p1037_p10), %s1100_s18, 1024, %s1098_s21, %s1104_s27, %s961_s14, %s961_s14, %s962_s15  }
 0x1ee PF: > { %p847_p6 = scmp.ge.s32.totalorder %s957_s26, 2  ;;  %s613_s16 = sand.u32 1, %s945_s0  }
 0x1ef   : > { %s614_s17 = scalar_lea.sflag [#allocation6], %s613_s16 }
 0x1f0   : > { %p844_p7 = pnand %p847_p6, %p1041_p11 }
 0x1f2   : > { %p845_p8 = pneg %p844_p7 }
 0x1f4   : > { %940 = dma.done.wait (%p845_p8), %s614_s17, 1024  }
 0x1f5   : > { %942 = vsyncadd (%p845_p8), %s614_s17, 4294966272  ;;  %p22_p9 = scmp.ge.s32.totalorder %s1024_s29, 6   ;;  %s1152_s0 = smov %s949_s25 }
 0x1f6   : > { %s1153_s25 = smov %s953_s1  ;;  %s1154_s1 = smov %s1035_s7 }
 0x1f7   : > { %s1155_s26 = smov %s1024_s29  ;;  %24 = sbr.rel (!%p22_p9) target bundleno = 18 (0x12), region = 77 }
 0x1fc   :  { %619 = vsyncpa [#allocation6], 1 }
 0x1fd   :  { %621 = vsyncpa [#allocation6 + $0x1], 1 }

</bundles_post_ra>
